<compile_context>
chip_gen: v5e
topology: v5e:2x2
jax: 0.10.0
libtpu: 0.0.40
codegen_flags: <defaults>
</compile_context>

<pallas_src>
import jax
import jax.numpy as jnp
from jax.experimental import pallas as pl
from jax.experimental.pallas import tpu as pltpu

LANES = 128
SUB = 8


def _sq_err_partial_kernel(img_ref, rec_ref, out_ref):
    """Per-shard sum of squared error, accumulated into an (8,128) out block."""
    k = pl.program_id(1)

    @pl.when(k == 0)
    def _():
        out_ref[...] = jnp.zeros_like(out_ref)

    diff = rec_ref[...].astype(jnp.float32) - img_ref[...].astype(jnp.float32)
    sq = diff * diff
    # Fold (tile_rows, 128) down to one (8, 128) vreg tile with leading-axis
    # VPU adds (no cross-lane / XLU work per step); the single cross-lane
    # reduce over (num_shards, 8, 128) happens once in the wrapper.
    out_ref[0] += jnp.sum(sq.reshape(-1, SUB, LANES), axis=0)


def capsule_loss_margin(images, labels, classes, reconstructions,
                        *, tile_rows=4096, num_shards=2):
    """Pallas implementation of CapsuleLoss(loss_func='margin').forward."""
    B = reconstructions.shape[0]
    imgs = images.reshape(-1)
    recs = reconstructions.reshape(-1)
    assert imgs.size == recs.size, "images and reconstructions must match in size"

    total = imgs.size
    rows = (total + LANES - 1) // LANES
    # Tile rows: multiple of 8 sublanes, no bigger than the (padded) problem.
    tile_rows = max(SUB, min(int(tile_rows), ((rows + SUB - 1) // SUB) * SUB))
    tile_rows = (tile_rows // SUB) * SUB
    steps_total = (rows + tile_rows - 1) // tile_rows
    # Shard the reduction across a leading parallel axis (v7x: 2 TensorCores).
    num_shards = max(1, min(int(num_shards), steps_total))
    steps_per_shard = (steps_total + num_shards - 1) // num_shards

    padded_rows = num_shards * steps_per_shard * tile_rows
    pad = padded_rows * LANES - total
    if pad:
        # Both sides padded with zeros -> padded region contributes 0 to SSE.
        imgs = jnp.pad(imgs, (0, pad))
        recs = jnp.pad(recs, (0, pad))
    imgs2 = imgs.reshape(padded_rows, LANES)
    recs2 = recs.reshape(padded_rows, LANES)

    row_map = lambda s, k, steps=steps_per_shard: (s * steps + k, 0)

    partials = pl.pallas_call(
        _sq_err_partial_kernel,
        out_shape=jax.ShapeDtypeStruct((num_shards, SUB, LANES), jnp.float32),
        grid_spec=pltpu.PrefetchScalarGridSpec(
            num_scalar_prefetch=0,
            grid=(num_shards, steps_per_shard),
            in_specs=[
                pl.BlockSpec((tile_rows, LANES), row_map),   # images (flat)
                pl.BlockSpec((tile_rows, LANES), row_map),   # reconstructions
            ],
            out_specs=pl.BlockSpec((1, SUB, LANES), lambda s, k: (s, 0, 0)),
        ),
        compiler_params=pltpu.CompilerParams(
            dimension_semantics=("parallel", "arbitrary")),
    )(imgs2, recs2)

    reconstruction_loss = jnp.sum(partials)

    # Margin term (tiny: B x NUM_CLASSES) computed in the wrapper.
    classes_f = classes.astype(jnp.float32)
    labels_f = labels.astype(jnp.float32)
    left = jnp.maximum(0.9 - classes_f, 0.0) ** 2
    right = jnp.maximum(classes_f - 0.1, 0.0) ** 2
    margin = jnp.sum(labels_f * left + 0.5 * (1.0 - labels_f) * right)

    return (margin + 0.0005 * reconstruction_loss) / jnp.float32(B)


def _reference(images, labels, classes, reconstructions):
    B = reconstructions.shape[0]
    imgs = images.reshape(B, -1).astype(jnp.float32)
    recs = reconstructions.reshape(B, -1).astype(jnp.float32)
    recon = jnp.sum((recs - imgs) ** 2)
    left = jnp.maximum(0.9 - classes, 0.0) ** 2
    right = jnp.maximum(classes - 0.1, 0.0) ** 2
    margin = jnp.sum(labels * left + 0.5 * (1.0 - labels) * right)
    return (margin + 0.0005 * recon) / B


if __name__ == "__main__":
    # TODO(synk): only the default 'margin' loss path is implemented; the
    # 'ce' / 'mse' variants of the original module are not translated.
    B, C, H, W = 2, 4, 16, 16
    NUM_CLASSES = 10
    D = C * H * W

    key = jax.random.PRNGKey(0)
    k1, k2, k3, k4 = jax.random.split(key, 4)

    images = jax.random.normal(k1, (B, C, H, W), dtype=jnp.float32)
    reconstructions = jax.random.normal(k2, (B, D), dtype=jnp.float32)
    classes = jax.random.uniform(k3, (B, NUM_CLASSES), dtype=jnp.float32)
    label_ids = jax.random.randint(k4, (B,), 0, NUM_CLASSES)
    labels = jax.nn.one_hot(label_ids, NUM_CLASSES, dtype=jnp.float32)

    loss_fn = jax.jit(capsule_loss_margin)
    out = loss_fn(images, labels, classes, reconstructions)
    out = jax.block_until_ready(out)

    ref = _reference(images, labels, classes, reconstructions)
    assert jnp.allclose(out, ref, rtol=1e-4, atol=1e-4), (out, ref)

    print("KERNEL_OK")
</pallas_src>

<mosaic_0001>
module attributes {stable_mosaic.version = 11 : i64} {
  func.func @_sq_err_partial_kernel(%arg0: i32, %arg1: i32, %arg2: memref<16x128xf32, #tpu.memory_space<vmem>>, %arg3: memref<16x128xf32, #tpu.memory_space<vmem>>, %arg4: memref<1x8x128xf32, #tpu.memory_space<vmem>>) attributes {dimension_semantics = [#tpu.dimension_semantics<parallel>, #tpu.dimension_semantics<arbitrary>], iteration_bounds = array<i64: 1, 1>, scalar_prefetch = 0 : i64, scratch_operands = 0 : i64, tpu.core_type = #tpu.core_type<tc>, window_params = [{transform_indices = @transform_0, window_bounds = array<i64: 16, 128>}, {transform_indices = @transform_1, window_bounds = array<i64: 16, 128>}, {transform_indices = @transform_2, window_bounds = array<i64: 1, 8, 128>}]} {
    %c0_i32 = arith.constant 0 : i32
    %0 = arith.cmpi eq, %arg1, %c0_i32 : i32
    %1 = arith.extui %0 : i1 to i32
    %c0_i32_0 = arith.constant 0 : i32
    %2 = arith.cmpi ne, %1, %c0_i32_0 : i32
    scf.if %2 {
      %cst_10 = arith.constant 0.000000e+00 : f32
      %15 = vector.broadcast %cst_10 : f32 to vector<1x8x128xf32>
      %c0_11 = arith.constant 0 : index
      %c0_12 = arith.constant 0 : index
      %c0_13 = arith.constant 0 : index
      %16 = vector.load %arg4[%c0_11, %c0_12, %c0_13] : memref<1x8x128xf32, #tpu.memory_space<vmem>>, vector<1x8x128xf32>
      tpu.vector_store %arg4[%c0_11, %c0_12, %c0_13], %15 {strides = array<i32>} : memref<1x8x128xf32, #tpu.memory_space<vmem>>, vector<1x8x128xf32>,
    } else {
    }
    %c0 = arith.constant 0 : index
    %c0_1 = arith.constant 0 : index
    %3 = vector.load %arg3[%c0, %c0_1] : memref<16x128xf32, #tpu.memory_space<vmem>>, vector<16x128xf32>
    %c0_2 = arith.constant 0 : index
    %c0_3 = arith.constant 0 : index
    %4 = vector.load %arg2[%c0_2, %c0_3] : memref<16x128xf32, #tpu.memory_space<vmem>>, vector<16x128xf32>
    %5 = arith.subf %3, %4 : vector<16x128xf32>
    %6 = arith.mulf %5, %5 : vector<16x128xf32>
    %c0_4 = arith.constant 0 : index
    %c0_5 = arith.constant 0 : index
    %c0_6 = arith.constant 0 : index
    %7 = vector.load %arg4[%c0_4, %c0_5, %c0_6] : memref<1x8x128xf32, #tpu.memory_space<vmem>>, vector<1x8x128xf32>
    %8 = vector.shape_cast %7 : vector<1x8x128xf32> to vector<8x128xf32>
    %9 = vector.shape_cast %6 : vector<16x128xf32> to vector<2x8x128xf32>
    %cst = arith.constant dense<0.000000e+00> : vector<8x128xf32>
    %10 = vector.multi_reduction <add>, %9, %cst [0] : vector<2x8x128xf32> to vector<8x128xf32>
    %11 = arith.addf %8, %10 : vector<8x128xf32>
    %c0_7 = arith.constant 0 : index
    %c0_8 = arith.constant 0 : index
    %c0_9 = arith.constant 0 : index
    %12 = vector.load %arg4[%c0_7, %c0_8, %c0_9] : memref<1x8x128xf32, #tpu.memory_space<vmem>>, vector<1x8x128xf32>
    %13 = vector.shape_cast %12 : vector<1x8x128xf32> to vector<8x128xf32>
    %14 = vector.shape_cast %11 : vector<8x128xf32> to vector<1x8x128xf32>
    tpu.vector_store %arg4[%c0_7, %c0_8, %c0_9], %14 {strides = array<i32>} : memref<1x8x128xf32, #tpu.memory_space<vmem>>, vector<1x8x128xf32>,
    return
  }
  func.func @transform_0(%arg0: i32, %arg1: i32) -> (i32, i32) {
    %c1_i32 = arith.constant 1 : i32
    %0 = arith.muli %arg0, %c1_i32 : i32
    %1 = arith.addi %0, %arg1 : i32
    %c0_i32 = arith.constant 0 : i32
    %c0_i32_0 = arith.constant 0 : i32
    return %1, %c0_i32 : i32, i32
  }
  func.func @transform_1(%arg0: i32, %arg1: i32) -> (i32, i32) {
    %c1_i32 = arith.constant 1 : i32
    %0 = arith.muli %arg0, %c1_i32 : i32
    %1 = arith.addi %0, %arg1 : i32
    %c0_i32 = arith.constant 0 : i32
    %c0_i32_0 = arith.constant 0 : i32
    return %1, %c0_i32 : i32, i32
  }
  func.func @transform_2(%arg0: i32, %arg1: i32) -> (i32, i32, i32) {
    %c0_i32 = arith.constant 0 : i32
    %c0_i32_0 = arith.constant 0 : i32
    %c0_i32_1 = arith.constant 0 : i32
    return %arg0, %c0_i32, %c0_i32_0 : i32, i32, i32
  }
}

</mosaic_0001>

<bundles_post_ra>
// kernel: capsule_loss_margin.1
= control target key start
LH: loop header
LB: loop body
LE: loop exit
PB: predicated region body
PF: predicated region fallthrough
CT: control target
= control target key end

     0   :  { %s119_s0 = inlined_call_operand.vmem [shape: f32[16,128], index: 0, kind: input, shape index: {}]   ;;  %s120_s1 = inlined_call_operand.vmem [shape: f32[16,128], index: 1, kind: input, shape index: {}]   ;;  %s121_s2 = inlined_call_operand.vmem [shape: f32[1,8,128], index: 2, kind: output, shape index: {}]  }
   0x1   :  { %v60_v0 = vld [vmem:[%s120_s1] sm:$0xff]  ;;  %v61_v1 = vld [vmem:[%s120_s1 + $0x8] sm:$0xff] }
   0x2   :  { %v62_v2 = vld [vmem:[%s119_s0] sm:$0xff]  ;;  %v63_v3 = vld [vmem:[%s119_s0 + $0x8] sm:$0xff] }
   0x3   :  { %v64_v4 = vsub.f32 %v60_v0, %v62_v2  ;;  %v65_v5 = vsub.f32 %v61_v1, %v63_v3 }
   0x5   :  { %v66_v6 = vmul.f32 %v64_v4, %v64_v4  ;;  %v67_v7 = vmul.f32 %v65_v5, %v65_v5 }
   0x7   :  { %v69_v8 = vadd.f32 %v67_v7, %v66_v6 }
   0x9   :  { %71 = vst [vmem:[%s121_s2] sm:$0xff] %v69_v8 }

</bundles_post_ra>
